<compile_context>
chip_gen: v5e
topology: v5e:2x2
jax: 0.10.0
libtpu: 0.0.40
codegen_flags: <defaults>
</compile_context>

<pallas_src>
import functools

import jax
import jax.numpy as jnp
from jax.experimental import pallas as pl
from jax.experimental.pallas import tpu as pltpu


def _round_up(n, m):
    return ((n + m - 1) // m) * m


def _snake_beta_kernel(p_ref, x_ref, o_ref):
    # p_ref: (2, Rt, 1)  -- row 0: exp(alpha), row 1: 1/(exp(beta)+1e-9)
    # x_ref / o_ref: (Rt, Tt) tile of the (flattened) input / output
    a = p_ref[0]                               # (Rt, 1)
    inv_b = p_ref[1]                           # (Rt, 1)
    x = x_ref[...].astype(jnp.float32)         # compute in f32 (v5e: no bf16 VPU)
    s = jnp.sin(x * a)                         # broadcast over lanes
    o_ref[...] = (x + inv_b * (s * s)).astype(o_ref.dtype)


@functools.partial(jax.jit, static_argnames=("t_tile_max", "row_tile_max"))
def snake_beta_pallas(x, alpha, beta, *, t_tile_max=2048, row_tile_max=256):
    """x: (B, C, T); alpha, beta: (C,) log-scale params (as in the module)."""
    B, C, T = x.shape
    R = B * C
    out_dtype = x.dtype

    # Hoist the per-channel parameter math out of the per-tile loop (O(C) work).
    a_exp = jnp.exp(alpha.astype(jnp.float32))                   # (C,)
    inv_b = 1.0 / (jnp.exp(beta.astype(jnp.float32)) + 1e-9)     # (C,)
    # Row r of the flattened (B*C, T) view corresponds to channel r % C.
    a_rows = jnp.tile(a_exp, B)                                  # (R,)
    ib_rows = jnp.tile(inv_b, B)                                 # (R,)
    params = jnp.stack([a_rows, ib_rows], axis=0)[..., None]     # (2, R, 1)

    # Sublane granularity depends on element width (f32: 8, bf16: 16, int8: 32).
    sub = {4: 8, 2: 16, 1: 32}.get(jnp.dtype(out_dtype).itemsize, 8)

    # Pick big lane-dense tiles, clamped to the (rounded-up) problem size.
    t_tile = min(t_tile_max, _round_up(T, 128))
    row_tile = min(row_tile_max, _round_up(R, sub))

    Tp = _round_up(T, t_tile)
    Rp = _round_up(R, row_tile)

    x2 = x.reshape(R, T)
    if (Rp, Tp) != (R, T):
        x2 = jnp.pad(x2, ((0, Rp - R), (0, Tp - T)))
        params = jnp.pad(params, ((0, 0), (0, Rp - R), (0, 0)))

    grid = (Rp // row_tile, Tp // t_tile)

    out2 = pl.pallas_call(
        _snake_beta_kernel,
        out_shape=jax.ShapeDtypeStruct((Rp, Tp), out_dtype),
        grid_spec=pltpu.PrefetchScalarGridSpec(
            num_scalar_prefetch=0,
            grid=grid,
            in_specs=[
                # fused params: one tiny block per row-tile, constant over time
                pl.BlockSpec((2, row_tile, 1), lambda r, t: (0, r, 0)),
                # input: (row_tile, t_tile) tile
                pl.BlockSpec((row_tile, t_tile), lambda r, t: (r, t)),
            ],
            out_specs=pl.BlockSpec((row_tile, t_tile), lambda r, t: (r, t)),
        ),
        compiler_params=pltpu.CompilerParams(
            dimension_semantics=("parallel", "parallel"),
        ),
    )(params, x2)

    return out2[:R, :T].reshape(B, C, T)


def snake_beta_ref(x, alpha, beta):
    a = jnp.exp(alpha)[None, :, None]
    b = jnp.exp(beta)[None, :, None]
    return x + 1.0 / (b + 1e-9) * jnp.sin(x * a) ** 2


if __name__ == "__main__":
    key = jax.random.PRNGKey(0)
    kx, ka, kb = jax.random.split(key, 3)

    # Small shapes consistent with the module: batch=2, channels=8, time=300
    # (T deliberately not a multiple of 128 to exercise the padding path).
    B, C, T = 2, 8, 300
    x = jax.random.normal(kx, (B, C, T), dtype=jnp.float32)
    alpha = 0.1 * jax.random.normal(ka, (C,), dtype=jnp.float32)
    beta = 0.1 * jax.random.normal(kb, (C,), dtype=jnp.float32)

    # f32 path
    out = jax.block_until_ready(snake_beta_pallas(x, alpha, beta))
    ref = snake_beta_ref(x, alpha, beta)
    assert out.shape == (B, C, T)
    assert jnp.allclose(out, ref, atol=1e-5, rtol=1e-5), "f32 mismatch vs reference"

    # bf16 I/O path (kernel computes in f32, stores bf16)
    xb = x.astype(jnp.bfloat16)
    outb = jax.block_until_ready(snake_beta_pallas(xb, alpha, beta))
    refb = snake_beta_ref(xb.astype(jnp.float32), alpha, beta)
    assert outb.dtype == jnp.bfloat16
    assert jnp.allclose(outb.astype(jnp.float32), refb, atol=5e-2, rtol=5e-2), \
        "bf16 mismatch vs reference"

    print("KERNEL_OK")
</pallas_src>

<mosaic_0001>
module attributes {stable_mosaic.version = 11 : i64} {
  func.func @_snake_beta_kernel(%arg0: i32, %arg1: i32, %arg2: memref<2x16x1xf32, #tpu.memory_space<vmem>>, %arg3: memref<16x384xf32, #tpu.memory_space<vmem>>, %arg4: memref<16x384xf32, #tpu.memory_space<vmem>>) attributes {dimension_semantics = [#tpu.dimension_semantics<parallel>, #tpu.dimension_semantics<parallel>], iteration_bounds = array<i64: 1, 1>, scalar_prefetch = 0 : i64, scratch_operands = 0 : i64, tpu.core_type = #tpu.core_type<tc>, window_params = [{transform_indices = @transform_0, window_bounds = array<i64: 2, 16, 1>}, {transform_indices = @transform_1, window_bounds = array<i64: 16, 384>}, {transform_indices = @transform_2, window_bounds = array<i64: 16, 384>}]} {
    %c0 = arith.constant 0 : index
    %c0_0 = arith.constant 0 : index
    %c0_1 = arith.constant 0 : index
    %0 = vector.load %arg2[%c0, %c0_0, %c0_1] : memref<2x16x1xf32, #tpu.memory_space<vmem>>, vector<1x16x1xf32>
    %1 = vector.shape_cast %0 : vector<1x16x1xf32> to vector<16x1xf32>
    %c1 = arith.constant 1 : index
    %c0_2 = arith.constant 0 : index
    %c0_3 = arith.constant 0 : index
    %2 = vector.load %arg2[%c1, %c0_2, %c0_3] : memref<2x16x1xf32, #tpu.memory_space<vmem>>, vector<1x16x1xf32>
    %3 = vector.shape_cast %2 : vector<1x16x1xf32> to vector<16x1xf32>
    %c0_4 = arith.constant 0 : index
    %c0_5 = arith.constant 0 : index
    %4 = vector.load %arg3[%c0_4, %c0_5] : memref<16x384xf32, #tpu.memory_space<vmem>>, vector<16x384xf32>
    %5 = vector.broadcast %1 : vector<16x1xf32> to vector<16x384xf32>
    %6 = arith.mulf %4, %5 : vector<16x384xf32>
    %7 = math.sin %6 : vector<16x384xf32>
    %8 = arith.mulf %7, %7 : vector<16x384xf32>
    %9 = vector.broadcast %3 : vector<16x1xf32> to vector<16x384xf32>
    %10 = arith.mulf %9, %8 : vector<16x384xf32>
    %11 = arith.addf %4, %10 : vector<16x384xf32>
    %c0_6 = arith.constant 0 : index
    %c0_7 = arith.constant 0 : index
    %12 = vector.load %arg4[%c0_6, %c0_7] : memref<16x384xf32, #tpu.memory_space<vmem>>, vector<16x384xf32>
    tpu.vector_store %arg4[%c0_6, %c0_7], %11 {strides = array<i32>} : memref<16x384xf32, #tpu.memory_space<vmem>>, vector<16x384xf32>,
    return
  }
  func.func @transform_0(%arg0: i32, %arg1: i32) -> (i32, i32, i32) {
    %c0_i32 = arith.constant 0 : i32
    %c0_i32_0 = arith.constant 0 : i32
    %c0_i32_1 = arith.constant 0 : i32
    return %c0_i32, %arg0, %c0_i32_0 : i32, i32, i32
  }
  func.func @transform_1(%arg0: i32, %arg1: i32) -> (i32, i32) {
    %c0_i32 = arith.constant 0 : i32
    return %arg0, %arg1 : i32, i32
  }
  func.func @transform_2(%arg0: i32, %arg1: i32) -> (i32, i32) {
    %c0_i32 = arith.constant 0 : i32
    return %arg0, %arg1 : i32, i32
  }
}

</mosaic_0001>

<bundles_post_ra>
// kernel: tile.13
= control target key start
LH: loop header
LB: loop body
LE: loop exit
PB: predicated region body
PF: predicated region fallthrough
CT: control target
= control target key end

     0   :  { %s22_s0 = inlined_call_operand.vmem [shape: f32[8], index: 0, kind: input, shape index: {}]   ;;  %s23_s1 = inlined_call_operand.vmem [shape: f32[2,8], index: 1, kind: output, shape index: {}]  }
   0x1   :  { %v4_v0 = vld [vmem:[%s22_s0] ss:$0 sm:$0xff] }
   0x2   :  { %5 = vst [vmem:[%s23_s1] sm:$0x3] %v4_v0 }

// kernel: tile.18
= control target key start
LH: loop header
LB: loop body
LE: loop exit
PB: predicated region body
PF: predicated region fallthrough
CT: control target
= control target key end

     0   :  { %vm7_vm0 = vcmask 64512   ;;  %vm13_vm1 = vcmask 130112   ;;  %s39_s0 = inlined_call_operand.vmem [shape: f32[2,8], index: 0, kind: input, shape index: {}]   ;;  %s40_s1 = inlined_call_operand.vmem [shape: f32[1,16], index: 1, kind: output, shape index: {}]  }
   0x1   :  { %v4_v0 = vld [vmem:[%s39_s0] sm:$0x3]  ;;  %s22_s0 = smov 8  }
   0x2   :  { %5 = vst [vmem:[#allocation1] sm:$0x3] %v4_v0 }
   0x9   :  { %v10_v1 = vld [vmem:[#allocation1 + $0x1] sm:$0x1]   ;;  %v6_v2 = vld [vmem:[#allocation1] sm:$0x1]  }
   0xa   :  { %11 = vrot.lane.b32.xlu0 %v10_v1, %s22_s0  ;;  %8 = vst.msk [vmem:[#allocation0] sm:$0x1] %vm7_vm0, %v6_v2  }
  0x7c   :  { %v12_v3 = vpop.permute.xlu0 %11  }
  0x7d   :  { %14 = vst.msk [vmem:[#allocation0] sm:$0x1] %vm13_vm1, %v12_v3  }
  0x84   :  { %v17_v4 = vld [vmem:[#allocation0] sm:$0x1] }
  0x85   :  { %20 = vst [vmem:[%s40_s1] sm:$0x1] %v17_v4 }

// kernel: snake_beta_pallas.1
= control target key start
LH: loop header
LB: loop body
LE: loop exit
PB: predicated region body
PF: predicated region fallthrough
CT: control target
= control target key end

     0   :  { %v1040_v0 = vmov 0   ;;  %v1041_v37 = vmov 683565275   ;;  %v1042_v39 = vmov 2475754826   ;;  %s1920_s0 = inlined_call_operand.vmem [shape: f32[2,16,1], index: 0, kind: input, shape index: {}]   ;;  %s1921_s1 = inlined_call_operand.vmem [shape: f32[16,384], index: 1, kind: input, shape index: {}]   ;;  %s1922_s2 = inlined_call_operand.vmem [shape: f32[16,384], index: 2, kind: output, shape index: {}]  }
   0x1   :  { %1033 = vset.pattern.permute.xlu0 %v1040_v0  ;;  %v11_v1 = vld [vmem:[%s1920_s0] sm:$0xff]  ;;  %1034 = vset.pattern.permute.xlu1 %v1040_v0  ;;  %v1006_v2 = vld [vmem:[%s1920_s0 + $0x10] sm:$0xff]  ;;  %v12_v3 = vld [vmem:[%s1920_s0 + $0x8] sm:$0xff]  ;;  %v1043_v43 = vmov 2131351028  }
   0x2   :  { %24 = vperm.xlu0 %1033, %v11_v1   ;;  %976 = vperm.xlu1 %1034, %v1006_v2   ;;  %v1007_v4 = vld [vmem:[%s1920_s0 + $0x18] sm:$0xff]  ;;  %v16_v5 = vld [vmem:[%s1921_s1] sm:$0xff]  ;;  %v17_v6 = vld [vmem:[%s1921_s1 + $0x8] sm:$0xff]  ;;  %v1925_v46 = vmov 2102212464  }
   0x3   :  { %v18_v10 = vld [vmem:[%s1921_s1 + $0x10] sm:$0xff]  ;;  %v1045_v49 = vmov 920167782   ;;  %v1924_v52 = vmov 1326507024  }
   0xa   :  { %29 = vperm.xlu0 %1033, %v12_v3   ;;  %981 = vperm.xlu1 %1034, %v1007_v4  }
  0x74   :  { %v25_v7 = vpop.permute.xlu0 %24 }
  0x75   :  { %v1082_v8 = vmul.f32 %v25_v7, %v16_v5  ;;  %v1084_v9 = vmul.f32 %v25_v7, %v17_v6  ;;  %v1095_v17 = vmul.f32 %v25_v7, %v18_v10 }
  0x77   :  { %v38_v11 = vand.u32 2147483647, %v1082_v8  ;;  %v41_v12 = vand.u32 2139095040, %v1082_v8  ;;  %v193_v13 = vand.u32 2147483647, %v1084_v9  ;;  %v196_v14 = vand.u32 2139095040, %v1084_v9 }
  0x78   :  { %v351_v25 = vand.u32 2139095040, %v1095_v17 }
  0x79   :  { %v42_v15 = vshrl.u32 %v41_v12, 23  ;;  %v45_v16 = vand.u32 8388607, %v38_v11  ;;  %v197_v18 = vshrl.u32 %v196_v14, 23  ;;  %v200_v21 = vand.u32 8388607, %v193_v13 }
  0x7a   :  { %v1102_v31 = vshrl.u32 %v351_v25, 23 }
  0x7b   :  { %v1008_v19 = vadd.s32 4294967169, %v42_v15  ;;  %v46_v20 = vor.u32 8388608, %v45_v16  ;;  %v1011_v22 = vadd.s32 4294967169, %v197_v18  ;;  %v201_v27 = vor.u32 8388608, %v200_v21 }
  0x7d   :  { %v48_v23 = vadd.s32 1, %v1008_v19  ;;  %v203_v24 = vadd.s32 1, %v1011_v22  ;;  %v1100_v26 = vshll.u32 %v46_v20, 8  ;;  %v1109_v35 = vshll.u32 %v201_v27, 8 }
  0x7f   :  { %vm49_vm0 = vcmp.gt.s32.totalorder %v48_v23, 0  ;;  %vm204_vm1 = vcmp.gt.s32.totalorder %v203_v24, 0  ;;  %v1105_v33 = vand.u32 65535, %v1100_v26  ;;  %v88_v41 = vshrl.u32 %v1100_v26, 16 }
  0x80   :  { %v50_v28 = vsel %vm49_vm0, %v48_v23, 0  ;;  %v205_v30 = vsel %vm204_vm1, %v203_v24, 0 }
  0x81   :  { %v52_v29 = vand.u32 31, %v50_v28  ;;  %v1107_v34 = vand.u32 31, %v205_v30  ;;  %v1111_v36 = vshrl.u32 %v50_v28, 5  ;;  %v1156_v22 = vshrl.u32 %v205_v30, 5 }
  0x83   :  { %v53_v32 = vsub.s32 32, %v52_v29  ;;  %v55_v38 = vshll.u32 %v1041_v37, %v52_v29  ;;  %v58_v40 = vshll.u32 %v1042_v39, %v52_v29  ;;  %v61_v45 = vshll.u32 %v1043_v43, %v52_v29 }
  0x84   :  { %v64_v48 = vshll.u32 %v1925_v46, %v52_v29  ;;  %v67_v51 = vshll.u32 %v1045_v49, %v52_v29  ;;  %v1125_v57 = vsub.s32 32, %v1107_v34  ;;  %vm70_vm2 = vcmp.lt.s32.totalorder %v1111_v36, 1 }
  0x85   :  { %v56_v42 = vshrl.u32 %v1042_v39, %v53_v32  ;;  %v59_v44 = vshrl.u32 %v1043_v43, %v53_v32  ;;  %v62_v47 = vshrl.u32 %v1925_v46, %v53_v32  ;;  %v65_v50 = vshrl.u32 %v1045_v49, %v53_v32 }
  0x86   :  { %v68_v53 = vshrl.u32 %v1924_v52, %v53_v32  ;;  %vm71_vm3 = vcmp.lt.s32.totalorder %v1111_v36, 2  ;;  %v54_v60 = vshrl.u32 %v1041_v37, %v53_v32  ;;  %vm73_vm4 = vcmp.lt.s32.totalorder %v1111_v36, 4 }
  0x87   :  { %v57_v54 = vor.u32 %v56_v42, %v55_v38  ;;  %v60_v55 = vor.u32 %v59_v44, %v58_v40  ;;  %v63_v56 = vor.u32 %v62_v47, %v61_v45  ;;  %v66_v58 = vor.u32 %v65_v50, %v64_v48 }
  0x88   :  { %v69_v59 = vor.u32 %v68_v53, %v67_v51  ;;  %vm72_vm5 = vcmp.lt.s32.totalorder %v1111_v36, 3  ;;  %v210_v2 = vshll.u32 %v1041_v37, %v1107_v34  ;;  %v211_v6 = vshrl.u32 %v1042_v39, %v1125_v57 }
  0x89   :  { %v78_v61 = vsel %vm70_vm2, %v57_v54, %v60_v55  ;;  %v82_v62 = vsel %vm70_vm2, %v60_v55, %v63_v56  ;;  %v79_v63 = vsel %vm73_vm4, %v66_v58, 920167782  ;;  %v75_v3 = vsel %vm73_vm4, %v63_v56, 2102212464 }
  0x8a   :  { %v83_v1 = vsel %vm73_vm4, %v69_v59, 1326507024  ;;  %v80_v4 = vsel %vm72_vm5, %v63_v56, %v79_v63  ;;  %v213_v12 = vshll.u32 %v1042_v39, %v1107_v34  ;;  %v214_v14 = vshrl.u32 %v1043_v43, %v1125_v57 }
  0x8b   :  { %v84_v5 = vsel %vm72_vm5, %v66_v58, %v83_v1  ;;  %v81_v7 = vsel %vm71_vm3, %v78_v61, %v80_v4  ;;  %v74_v20 = vsel %vm70_vm2, %v54_v60, %v57_v54  ;;  %v76_v21 = vsel %vm72_vm5, %v60_v55, %v75_v3 }
  0x8c   :  { %v85_v10 = vsel %vm71_vm3, %v82_v62, %v84_v5  ;;  %v111_v18 = vand.u32 65535, %v81_v7  ;;  %v112_v19 = vshrl.u32 %v81_v7, 16  ;;  %v1158_v23 = vor.u32 %v211_v6, %v210_v2 }
  0x8d   :  { %v89_v15 = vand.u32 65535, %v85_v10  ;;  %v90_v16 = vshrl.u32 %v85_v10, 16  ;;  %v1161_v27 = vor.u32 %v214_v14, %v213_v12  ;;  %v217_v28 = vshrl.u32 %v1925_v46, %v1125_v57 }
  0x8e   :  { %v114_v32 = vmul.u32 %v112_v19, %v1105_v33  ;;  %v115_v38 = vmul.u32 %v111_v18, %v88_v41  ;;  %v216_v40 = vshll.u32 %v1043_v43, %v1107_v34  ;;  %v113_v44 = vmul.u32 %v111_v18, %v1105_v33 }
  0x8f   :  { %v92_v24 = vmul.u32 %v90_v16, %v1105_v33  ;;  %v93_v25 = vmul.u32 %v89_v15, %v88_v41  ;;  %v91_v29 = vmul.u32 %v89_v15, %v1105_v33  ;;  %v94_v30 = vmul.u32 %v90_v16, %v88_v41 }
  0x90   :  { %v116_v45 = vmul.u32 %v112_v19, %v88_v41  ;;  %v117_v51 = vshll.u32 %v114_v32, 16  ;;  %v119_v54 = vshll.u32 %v115_v38, 16  ;;  %v1170_v55 = vor.u32 %v217_v28, %v216_v40 }
  0x91   :  { %v95_v42 = vshll.u32 %v92_v24, 16  ;;  %v96_v47 = vshrl.u32 %v92_v24, 16  ;;  %v97_v48 = vshll.u32 %v93_v25, 16  ;;  %v98_v50 = vshrl.u32 %v93_v25, 16 }
  0x92   :  { %vm121_vm7 = vc.u32 %v113_v44, %v117_v51  ;;  %v123_v58 = vadd.s32 %v117_v51, %v113_v44  ;;  %v220_v59 = vshrl.u32 %v1045_v49, %v1125_v57  ;;  %v219_v41 = vshll.u32 %v1925_v46, %v1107_v34 }
  0x93   :  { %vm99_vm6 = vc.u32 %v91_v29, %v95_v42  ;;  %v101_v53 = vadd.s32 %v95_v42, %v91_v29  ;;  %v122_v33 = vsel %vm121_vm7, 1, %v1040_v0  ;;  %v222_v63 = vshll.u32 %v1045_v49, %v1107_v34 }
  0x94   :  { %v100_v56 = vsel %vm99_vm6, 1, %v1040_v0  ;;  %v124_v62 = vadd.s32 %v122_v33, %v116_v45  ;;  %vm125_vm9 = vc.u32 %v123_v58, %v119_v54  ;;  %v221_v3 = vor.u32 %v220_v59, %v219_v41 }
  0x95   :  { %v102_v60 = vadd.s32 %v100_v56, %v94_v30  ;;  %vm103_vm8 = vc.u32 %v101_v53, %v97_v48  ;;  %v126_v2 = vsel %vm125_vm9, 1, %v1040_v0  ;;  %v223_v4 = vshrl.u32 %v1924_v52, %v1125_v57 }
  0x96   :  { %v104_v61 = vsel %vm103_vm8, 1, %v1040_v0  ;;  %v118_v5 = vshrl.u32 %v114_v32, 16  ;;  %v120_v6 = vshrl.u32 %v115_v38, 16  ;;  %v1184_v7 = vadd.s32 %v123_v58, %v119_v54 }
  0x97   :  { %v106_v1 = vadd.s32 %v104_v61, %v102_v60  ;;  %v128_v10 = vadd.s32 %v126_v2, %v124_v62  ;;  %v224_v14 = vor.u32 %v223_v4, %v222_v63  ;;  %vm225_vm10 = vcmp.lt.s32.totalorder %v1156_v22, 1 }
  0x98   :  { %vm228_vm11 = vcmp.lt.s32.totalorder %v1156_v22, 4  ;;  %vm227_vm12 = vcmp.lt.s32.totalorder %v1156_v22, 3  ;;  %v233_v34 = vsel %vm225_vm10, %v1158_v23, %v1161_v27  ;;  %vm226_vm13 = vcmp.lt.s32.totalorder %v1156_v22, 2 }
  0x99   :  { %v107_v12 = vadd.s32 %v106_v1, %v96_v47  ;;  %v129_v15 = vadd.s32 %v128_v10, %v118_v5  ;;  %v234_v16 = vsel %vm228_vm11, %v221_v3, 920167782  ;;  %v237_v24 = vsel %vm225_vm10, %v1161_v27, %v1170_v55 }
  0x9a   :  { %v235_v19 = vsel %vm227_vm12, %v1170_v55, %v234_v16  ;;  %v77_v25 = vsel %vm71_vm3, %v74_v20, %v76_v21  ;;  %v238_v32 = vsel %vm228_vm11, %v224_v14, 1326507024  ;;  %v242_v40 = vand.u32 65535, %v1109_v35 }
  0x9b   :  { %v1195_v18 = vadd.s32 %v107_v12, %v98_v50  ;;  %v130_v28 = vadd.s32 %v129_v15, %v120_v6  ;;  %v236_v29 = vsel %vm226_vm13, %v233_v34, %v235_v19  ;;  %v239_v38 = vsel %vm227_vm12, %v221_v3, %v238_v32 }
  0x9c   :  { %v266_v30 = vand.u32 65535, %v236_v29  ;;  %v240_v36 = vsel %vm226_vm13, %v237_v24, %v239_v38  ;;  %v243_v20 = vshrl.u32 %v1109_v35, 16  ;;  %v267_v21 = vshrl.u32 %v236_v29, 16 }
  0x9d   :  { %vm133_vm14 = vc.u32 %v1195_v18, %v1184_v7  ;;  %v134_v42 = vadd.s32 1, %v130_v28  ;;  %v131_v44 = vmul.u32 %v1100_v26, %v77_v25  ;;  %v244_v45 = vand.u32 65535, %v240_v36 }
  0x9e   :  { %v245_v47 = vshrl.u32 %v240_v36, 16  ;;  %v1014_v48 = vadd.s32 4294967169, %v1102_v31  ;;  %v269_v51 = vmul.u32 %v267_v21, %v242_v40  ;;  %v270_v53 = vmul.u32 %v266_v30, %v243_v20 }
  0x9f   :  { %v135_v50 = vsel %vm133_vm14, %v134_v42, %v130_v28  ;;  %v248_v58 = vmul.u32 %v244_v45, %v243_v20  ;;  %v268_v59 = vmul.u32 %v266_v30, %v242_v40  ;;  %v271_v60 = vmul.u32 %v267_v21, %v243_v20 }
  0xa0   :  { %v136_v54 = vadd.s32 %v135_v50, %v131_v44  ;;  %v247_v56 = vmul.u32 %v245_v47, %v242_v40  ;;  %v272_v33 = vshll.u32 %v269_v51, 16  ;;  %v246_v41 = vmul.u32 %v244_v45, %v242_v40 }
  0xa1   :  { %v249_v61 = vmul.u32 %v245_v47, %v243_v20  ;;  %v358_v63 = vadd.s32 1, %v1014_v48  ;;  %v274_v2 = vshll.u32 %v270_v53, 16  ;;  %v252_v3 = vshll.u32 %v248_v58, 16 }
  0xa2   :  { %v250_v62 = vshll.u32 %v247_v56, 16  ;;  %v137_v1 = vadd.s32 536870912, %v136_v54  ;;  %vm276_vm15 = vc.u32 %v268_v59, %v272_v33  ;;  %v278_v26 = vadd.s32 %v272_v33, %v268_v59 }
  0xa3   :  { %v277_v4 = vsel %vm276_vm15, 1, %v1040_v0  ;;  %vm359_vm3 = vcmp.gt.s32.totalorder %v358_v63, 0  ;;  %v251_v34 = vshrl.u32 %v247_v56, 16  ;;  %v230_v24 = vsel %vm228_vm11, %v1170_v55, 2102212464 }
  0xa4   :  { %vm254_vm0 = vc.u32 %v246_v41, %v250_v62  ;;  %v256_v31 = vadd.s32 %v250_v62, %v246_v41  ;;  %v279_v6 = vadd.s32 %v277_v4, %v271_v60  ;;  %vm280_vm1 = vc.u32 %v278_v26, %v274_v2 }
  0xa5   :  { %v255_v5 = vsel %vm254_vm0, 1, %v1040_v0  ;;  %v1223_v12 = vshrl.u32 %v137_v1, 30  ;;  %v281_v15 = vsel %vm280_vm1, 1, %v1040_v0  ;;  %v273_v25 = vshrl.u32 %v269_v51, 16 }
  0xa6   :  { %v257_v10 = vadd.s32 %v255_v5, %v249_v61  ;;  %vm258_vm2 = vc.u32 %v256_v31, %v252_v3  ;;  %v283_v19 = vadd.s32 %v281_v15, %v279_v6  ;;  %v360_v28 = vsel %vm359_vm3, %v358_v63, 0 }
  0xa7   :  { %v259_v14 = vsel %vm258_vm2, 1, %v1040_v0  ;;  %v209_v29 = vshrl.u32 %v1041_v37, %v1125_v57  ;;  %v253_v32 = vshrl.u32 %v248_v58, 16  ;;  %v139_v40 = vshll.u32 %v1223_v12, 30 }
  0xa8   :  { %v261_v16 = vadd.s32 %v259_v14, %v257_v10  ;;  %v275_v30 = vshrl.u32 %v270_v53, 16  ;;  %v284_v42 = vadd.s32 %v283_v19, %v273_v25  ;;  %v362_v36 = vand.u32 31, %v360_v28 }
  0xa9   :  { %v229_v20 = vsel %vm225_vm10, %v209_v29, %v1158_v23  ;;  %v231_v55 = vsel %vm227_vm12, %v1161_v27, %v230_v24  ;;  %v1241_v44 = vadd.s32 %v278_v26, %v274_v2  ;;  %v348_v45 = vand.u32 2147483647, %v1095_v17 }
  0xaa   :  { %v262_v38 = vadd.s32 %v261_v16, %v251_v34  ;;  %v285_v57 = vadd.s32 %v284_v42, %v275_v30  ;;  %v1244_v47 = vsub.s32 32, %v362_v36  ;;  %v1246_v48 = vsub.s32 %v136_v54, %v139_v40 }
  0xab   :  { %v232_v50 = vsel %vm226_vm13, %v229_v20, %v231_v55  ;;  %v355_v27 = vand.u32 8388607, %v348_v45  ;;  %v1262_v59 = vshrl.u32 %v360_v28, 5  ;;  %v365_v60 = vshll.u32 %v1041_v37, %v362_v36 }
  0xac   :  { %v1239_v21 = vadd.s32 %v262_v38, %v253_v32  ;;  %v289_v23 = vadd.s32 1, %v285_v57  ;;  %v366_v51 = vshrl.u32 %v1042_v39, %v1244_v47  ;;  %v286_v53 = vmul.u32 %v1109_v35, %v232_v50 }
  0xad   :  { %v369_v54 = vshrl.u32 %v1043_v43, %v1244_v47  ;;  %v372_v22 = vshrl.u32 %v1925_v46, %v1244_v47  ;;  %v142_v58 = vsub.s32 0, %v1246_v48  ;;  %v368_v33 = vshll.u32 %v1042_v39, %v362_v36 }
  0xae   :  { %vm288_vm4 = vc.u32 %v1239_v21, %v1241_v44  ;;  %v371_v41 = vshll.u32 %v1043_v43, %v362_v36  ;;  %v374_v61 = vshll.u32 %v1925_v46, %v362_v36  ;;  %v375_v35 = vshrl.u32 %v1045_v49, %v1244_v47 }
  0xaf   :  { %v290_v56 = vsel %vm288_vm4, %v289_v23, %v285_v57  ;;  %v378_v62 = vshrl.u32 %v1924_v52, %v1244_v47  ;;  %vm141_vm5 = vcmp.lt.s32.totalorder %v1246_v48, 0  ;;  %v1273_v1 = vor.u32 %v366_v51, %v365_v60 }
  0xb0   :  { %v291_v63 = vadd.s32 %v290_v56, %v286_v53  ;;  %v1275_v2 = vor.u32 %v369_v54, %v368_v33  ;;  %v1277_v26 = vor.u32 %v372_v22, %v371_v41  ;;  %v376_v3 = vor.u32 %v375_v35, %v374_v61  ;;  %v1316_v61 = vpop.permute.xlu0 %29  ;;  %v19_v35 = vld [vmem:[%s1921_s1 + $0x18] sm:$0xff] }
  0xb1   :  { %v377_v31 = vshll.u32 %v1045_v49, %v362_v36  ;;  %v356_v4 = vor.u32 8388608, %v355_v27  ;;  %v143_v5 = vsel %vm141_vm5, %v142_v58, %v1246_v48  ;;  %vm383_vm6 = vcmp.lt.s32.totalorder %v1262_v59, 4 }
  0xb2   :  { %v292_v10 = vadd.s32 536870912, %v291_v63  ;;  %vm380_vm7 = vcmp.lt.s32.totalorder %v1262_v59, 1  ;;  %vm382_vm8 = vcmp.lt.s32.totalorder %v1262_v59, 3  ;;  %v389_v14 = vsel %vm383_vm6, %v376_v3, 920167782 }
  0xb3   :  { %v379_v6 = vor.u32 %v378_v62, %v377_v31  ;;  %v388_v15 = vsel %vm380_vm7, %v1273_v1, %v1275_v2  ;;  %v390_v34 = vsel %vm382_vm8, %v1277_v26, %v389_v14  ;;  %v392_v16 = vsel %vm380_vm7, %v1275_v2, %v1277_v26 }
  0xb4   :  { %v1297_v19 = vshll.u32 %v356_v4, 8  ;;  %v144_v24 = vclz %v143_v5  ;;  %vm381_vm9 = vcmp.lt.s32.totalorder %v1262_v59, 2  ;;  %v1302_v28 = vshrl.u32 %v292_v10, 30 }
  0xb5   :  { %v393_v25 = vsel %vm383_vm6, %v379_v6, 1326507024  ;;  %v391_v29 = vsel %vm381_vm9, %v388_v15, %v390_v34  ;;  %v1325_v14 = vmul.f32 %v1316_v61, %v19_v35  ;;  %vm40_vm3 = vcmp.lt.s32.totalorder %v1082_v8, 0 }
  0xb6   :  { %v394_v32 = vsel %vm382_vm8, %v376_v3, %v393_v25  ;;  %v397_v40 = vand.u32 65535, %v1297_v19  ;;  %v1009_v36 = vadd.s32 4294967294, %v144_v24  ;;  %v398_v20 = vshrl.u32 %v1297_v19, 16 }
  0xb7   :  { %v395_v38 = vsel %vm381_vm9, %v392_v16, %v394_v32  ;;  %v422_v55 = vshrl.u32 %v391_v29, 16  ;;  %v294_v57 = vshll.u32 %v1302_v28, 30  ;;  %v421_v53 = vand.u32 65535, %v391_v29 }
  0xb8   :  { %v399_v30 = vand.u32 65535, %v395_v38  ;;  %v400_v42 = vshrl.u32 %v395_v38, 16  ;;  %vm1010_vm10 = vcmp.lt.s32.totalorder %v1009_v36, 0  ;;  %vm1397_vm4 = vcmp.le.f32.partialorder %v38_v11, 0.7853982 }
  0xb9   :  { %v424_v56 = vmul.u32 %v422_v55, %v397_v40  ;;  %v1313_v54 = vsub.s32 %v291_v63, %v294_v57  ;;  %v147_v33 = vsel %vm1010_vm10, 0, %v1009_v36  ;;  %v425_v3 = vmul.u32 %v421_v53, %v398_v20 }
  0xba   :  { %v402_v50 = vmul.u32 %v400_v42, %v397_v40  ;;  %v403_v23 = vmul.u32 %v399_v30, %v398_v20  ;;  %v401_v51 = vmul.u32 %v399_v30, %v397_v40  ;;  %v404_v22 = vmul.u32 %v400_v42, %v398_v20 }
  0xbb   :  { %v427_v31 = vshll.u32 %v424_v56, 16  ;;  %v297_v63 = vsub.s32 0, %v1313_v54  ;;  %v152_v5 = vsub.s32 4294967266, %v147_v33  ;;  %vm296_vm13 = vcmp.lt.s32.totalorder %v1313_v54, 0 }
  0xbc   :  { %v405_v27 = vshll.u32 %v402_v50, 16  ;;  %v407_v58 = vshll.u32 %v403_v23, 16  ;;  %v423_v10 = vmul.u32 %v421_v53, %v397_v40  ;;  %v406_v15 = vshrl.u32 %v402_v50, 16 }
  0xbd   :  { %v426_v34 = vmul.u32 %v422_v55, %v398_v20  ;;  %v429_v16 = vshll.u32 %v425_v3, 16  ;;  %v298_v25 = vsel %vm296_vm13, %v297_v63, %v1313_v54  ;;  %v153_v38 = vadd.s32 127, %v152_v5 }
  0xbe   :  { %vm409_vm11 = vc.u32 %v401_v51, %v405_v27  ;;  %v411_v60 = vadd.s32 %v405_v27, %v401_v51  ;;  %vm431_vm14 = vc.u32 %v423_v10, %v427_v31  ;;  %v433_v24 = vadd.s32 %v427_v31, %v423_v10 }
  0xbf   :  { %v410_v41 = vsel %vm409_vm11, 1, %v1040_v0  ;;  %v432_v32 = vsel %vm431_vm14, 1, %v1040_v0  ;;  %v385_v30 = vsel %vm383_vm6, %v1277_v26, 2102212464  ;;  %v148_v40 = vsub.s32 32, %v147_v33 }
  0xc0   :  { %v412_v62 = vadd.s32 %v410_v41, %v404_v22  ;;  %vm413_vm12 = vc.u32 %v411_v60, %v407_v58  ;;  %v434_v42 = vadd.s32 %v432_v32, %v426_v34  ;;  %vm435_vm15 = vc.u32 %v433_v24, %v429_v16 }
  0xc1   :  { %v414_v4 = vsel %vm413_vm12, 1, %v1040_v0  ;;  %v364_v36 = vshrl.u32 %v1041_v37, %v1244_v47  ;;  %v408_v20 = vshrl.u32 %v403_v23, 16  ;;  %v436_v55 = vsel %vm435_vm15, 1, %v1040_v0 }
  0xc2   :  { %v416_v6 = vadd.s32 %v414_v4, %v412_v62  ;;  %v299_v57 = vclz %v298_v25  ;;  %v428_v50 = vshrl.u32 %v424_v56, 16  ;;  %v438_v27 = vadd.s32 %v436_v55, %v434_v42 }
  0xc3   :  { %v506_v51 = vand.u32 2139095040, %v1325_v14  ;;  %v132_v53 = vadd.s32 %v1184_v7, %v1195_v18  ;;  %v384_v26 = vsel %vm380_vm7, %v364_v36, %v1273_v1  ;;  %v386_v22 = vsel %vm382_vm8, %v1275_v2, %v385_v30 }
  0xc4   :  { %v417_v29 = vadd.s32 %v416_v6, %v406_v15  ;;  %v154_v23 = vshll.u32 %v153_v38, 23  ;;  %v430_v58 = vshrl.u32 %v425_v3, 16  ;;  %v439_v60 = vadd.s32 %v438_v27, %v428_v50  ;;  %v20_v50 = vld [vmem:[%s1921_s1 + $0x20] sm:$0xff] }
  0xc5   :  { %v507_v56 = vshrl.u32 %v506_v51, 23  ;;  %v150_v41 = vshrl.u32 %v132_v53, %v148_v40  ;;  %v1346_v35 = vadd.s32 %v433_v24, %v429_v16  ;;  %v1012_v62 = vadd.s32 4294967294, %v299_v57 }
  0xc6   :  { %v1344_v47 = vadd.s32 %v417_v29, %v408_v20  ;;  %v387_v7 = vsel %vm381_vm9, %v384_v26, %v386_v22  ;;  %v440_v18 = vadd.s32 %v439_v60, %v430_v58  ;;  %v149_v1 = vshll.u32 %v1246_v48, %v147_v33 }
  0xc7   :  { %v1017_v31 = vadd.s32 4294967169, %v507_v56  ;;  %v155_v2 = vor.u32 4788187, %v154_v23  ;;  %v441_v3 = vmul.u32 %v1297_v19, %v387_v7  ;;  %vm1013_vm1 = vcmp.lt.s32.totalorder %v1012_v62, 0 }
  0xc8   :  { %vm443_vm0 = vc.u32 %v1344_v47, %v1346_v35  ;;  %v444_v63 = vadd.s32 1, %v440_v18  ;;  %v151_v5 = vor.u32 %v150_v41, %v149_v1  ;;  %v1354_v16 = vsel %vm1013_vm1, 0, %v1012_v62 }
  0xc9   :  { %v513_v4 = vadd.s32 1, %v1017_v31  ;;  %v156_v59 = vand.u32 2147483647, %v155_v2  ;;  %v503_v29 = vand.u32 2147483647, %v1325_v14  ;;  %v307_v19 = vsub.s32 4294967266, %v1354_v16 }
  0xca   :  { %v445_v6 = vsel %vm443_vm0, %v444_v63, %v440_v18  ;;  %v158_v25 = vcvt.s32.f32 %v151_v5  ;;  %v1393_v18 = vmul.f32 %v1316_v61, %v20_v50  ;;  %v287_v1 = vadd.s32 %v1241_v44, %v1239_v21 }
  0xcb   :  { %vm514_vm2 = vcmp.gt.s32.totalorder %v513_v4, 0  ;;  %v446_v10 = vadd.s32 %v445_v6, %v441_v3  ;;  %v510_v30 = vand.u32 8388607, %v503_v29  ;;  %v308_v55 = vadd.s32 127, %v307_v19 }
  0xcc   :  { %v515_v15 = vsel %vm514_vm2, %v513_v4, 0  ;;  %v159_v32 = vmul.f32 %v158_v25, %v156_v59  ;;  %v303_v4 = vsub.s32 32, %v1354_v16  ;;  %vm195_vm1 = vcmp.lt.s32.totalorder %v1084_v9, 0 }
  0xcd   :  { %v517_v34 = vand.u32 31, %v515_v15  ;;  %v447_v24 = vadd.s32 536870912, %v446_v10  ;;  %v511_v22 = vor.u32 8388608, %v510_v30  ;;  %v1382_v23 = vshrl.u32 %v515_v15, 5 }
  0xce   :  { %v160_v20 = vxor.u32 2147483648, %v159_v32  ;;  %v309_v6 = vshll.u32 %v308_v55, 23  ;;  %v304_v15 = vshll.u32 %v1313_v54, %v1354_v16  ;;  %v305_v19 = vshrl.u32 %v287_v1, %v303_v4 }
  0xcf   :  { %v1357_v48 = vshrl.u32 %v447_v24, 30  ;;  %v1359_v33 = vsub.s32 32, %v517_v34  ;;  %v520_v51 = vshll.u32 %v1041_v37, %v517_v34  ;;  %v523_v53 = vshll.u32 %v1042_v39, %v517_v34 }
  0xd0   :  { %v529_v26 = vshll.u32 %v1925_v46, %v517_v34  ;;  %v526_v58 = vshll.u32 %v1043_v43, %v517_v34  ;;  %v532_v7 = vshll.u32 %v1045_v49, %v517_v34  ;;  %v161_v63 = vsel %vm40_vm3, %v160_v20, %v159_v32 }
  0xd1   :  { %v449_v38 = vshll.u32 %v1357_v48, 30  ;;  %v521_v42 = vshrl.u32 %v1042_v39, %v1359_v33  ;;  %v524_v40 = vshrl.u32 %v1043_v43, %v1359_v33  ;;  %v530_v36 = vshrl.u32 %v1045_v49, %v1359_v33 }
  0xd2   :  { %v527_v57 = vshrl.u32 %v1925_v46, %v1359_v33  ;;  %v533_v60 = vshrl.u32 %v1924_v52, %v1359_v33  ;;  %vm535_vm6 = vcmp.lt.s32.totalorder %v1382_v23, 1  ;;  %vm538_vm7 = vcmp.lt.s32.totalorder %v1382_v23, 4 }
  0xd3   :  { %v1377_v27 = vsub.s32 %v446_v10, %v449_v38  ;;  %v1387_v56 = vor.u32 %v521_v42, %v520_v51  ;;  %v1389_v41 = vor.u32 %v524_v40, %v523_v53  ;;  %v531_v62 = vor.u32 %v530_v36, %v529_v26 }
  0xd4   :  { %v528_v2 = vor.u32 %v527_v57, %v526_v58  ;;  %v534_v5 = vor.u32 %v533_v60, %v532_v7  ;;  %vm537_vm8 = vcmp.lt.s32.totalorder %v1382_v23, 3  ;;  %v1417_v44 = vshll.u32 %v511_v22, 8 }
  0xd5   :  { %v452_v3 = vsub.s32 0, %v1377_v27  ;;  %vm451_vm5 = vcmp.lt.s32.totalorder %v1377_v27, 0  ;;  %v543_v11 = vsel %vm535_vm6, %v1387_v56, %v1389_v41  ;;  %v544_v21 = vsel %vm538_vm7, %v531_v62, 920167782 }
  0xd6   :  { %v1422_v10 = vsel %vm1397_vm4, %v1082_v8, %v161_v63  ;;  %vm536_vm9 = vcmp.lt.s32.totalorder %v1382_v23, 2  ;;  %v545_v59 = vsel %vm537_vm8, %v528_v2, %v544_v21  ;;  %v547_v25 = vsel %vm535_vm6, %v1389_v41, %v528_v2 }
  0xd7   :  { %v453_v34 = vsel %vm451_vm5, %v452_v3, %v1377_v27  ;;  %v546_v24 = vsel %vm536_vm9, %v543_v11, %v545_v59  ;;  %v548_v32 = vsel %vm538_vm7, %v534_v5, 1326507024  ;;  %v1437_v38 = vor.u32 4788187, %v309_v6 }
  0xd8   :  { %v549_v54 = vsel %vm537_vm8, %v531_v62, %v548_v32  ;;  %v661_v16 = vand.u32 2139095040, %v1393_v18  ;;  %v552_v42 = vand.u32 65535, %v1417_v44  ;;  %v576_v40 = vand.u32 65535, %v546_v24 }
  0xd9   :  { %v550_v30 = vsel %vm536_vm9, %v547_v25, %v549_v54  ;;  %v577_v36 = vshrl.u32 %v546_v24, 16  ;;  %v454_v20 = vclz %v453_v34  ;;  %v553_v55 = vshrl.u32 %v1417_v44, 16 }
  0xda   :  { %v554_v57 = vand.u32 65535, %v550_v30  ;;  %v555_v50 = vshrl.u32 %v550_v30, 16  ;;  %v1448_v53 = vmul.f32 %v1422_v10, %v1422_v10  ;;  %v306_v26 = vor.u32 %v305_v19, %v304_v15 }
  0xdb   :  { %v579_v51 = vmul.u32 %v577_v36, %v552_v42  ;;  %v580_v58 = vmul.u32 %v576_v40, %v553_v55  ;;  %v311_v60 = vand.u32 2147483647, %v1437_v38  ;;  %v662_v1 = vshrl.u32 %v661_v16, 23 }
  0xdc   :  { %v557_v22 = vmul.u32 %v555_v50, %v552_v42  ;;  %v558_v62 = vmul.u32 %v554_v57, %v553_v55  ;;  %v1015_v63 = vadd.s32 4294967294, %v454_v20  ;;  %v556_v4 = vmul.u32 %v554_v57, %v552_v42 }
  0xdd   :  { %v582_v7 = vshll.u32 %v579_v51, 16  ;;  %v578_v5 = vmul.u32 %v576_v40, %v552_v42  ;;  %v519_v6 = vshrl.u32 %v1041_v37, %v1359_v33  ;;  %v559_v11 = vmul.u32 %v555_v50, %v553_v55 }
  0xde   :  { %v560_v3 = vshll.u32 %v557_v22, 16  ;;  %v562_v21 = vshll.u32 %v558_v62, 16  ;;  %v581_v59 = vmul.u32 %v577_v36, %v553_v55  ;;  %v584_v15 = vshll.u32 %v580_v58, 16  ;;  %v1465_v55 = vld [vmem:[%s1921_s1 + $0x28] sm:$0xff] }
  0xdf   :  { %vm586_vm11 = vc.u32 %v578_v5, %v582_v7  ;;  %v588_v32 = vadd.s32 %v582_v7, %v578_v5  ;;  %v1020_v19 = vadd.s32 4294967169, %v662_v1  ;;  %vm1016_vm12 = vcmp.lt.s32.totalorder %v1015_v63, 0 }
  0xe0   :  { %vm564_vm10 = vc.u32 %v556_v4, %v560_v3  ;;  %v566_v34 = vadd.s32 %v560_v3, %v556_v4  ;;  %v587_v25 = vsel %vm586_vm11, 1, %v1040_v0  ;;  %v540_v33 = vsel %vm538_vm7, %v528_v2, 2102212464 }
  0xe1   :  { %v565_v24 = vsel %vm564_vm10, 1, %v1040_v0  ;;  %v589_v54 = vadd.s32 %v587_v25, %v581_v59  ;;  %vm590_vm14 = vc.u32 %v588_v32, %v584_v15  ;;  %v668_v30 = vadd.s32 1, %v1020_v19 }
  0xe2   :  { %v567_v38 = vadd.s32 %v565_v24, %v559_v11  ;;  %vm568_vm13 = vc.u32 %v566_v34, %v562_v21  ;;  %v539_v42 = vsel %vm535_vm6, %v519_v6, %v1387_v56  ;;  %v561_v40 = vshrl.u32 %v557_v22, 16 }
  0xe3   :  { %v569_v16 = vsel %vm568_vm13, 1, %v1040_v0  ;;  %v591_v20 = vsel %vm590_vm14, 1, %v1040_v0  ;;  %v1467_v57 = vsel %vm1016_vm12, 0, %v1015_v63  ;;  %v583_v2 = vshrl.u32 %v579_v51, 16 }
  0xe4   :  { %v571_v36 = vadd.s32 %v569_v16, %v567_v38  ;;  %v593_v50 = vadd.s32 %v591_v20, %v589_v54  ;;  %vm669_vm15 = vcmp.gt.s32.totalorder %v668_v30, 0  ;;  %v541_v7 = vsel %vm537_vm8, %v1389_v41, %v540_v33 }
  0xe5   :  { %v563_v1 = vshrl.u32 %v558_v62, 16  ;;  %v670_v22 = vsel %vm669_vm15, %v668_v30, 0  ;;  %v585_v4 = vshrl.u32 %v580_v58, 16  ;;  %v1923_v5 = vand.u32 2147483647, %v1393_v18 }
  0xe6   :  { %v572_v56 = vadd.s32 %v571_v36, %v561_v40  ;;  %v594_v3 = vadd.s32 %v593_v50, %v583_v2  ;;  %v672_v6 = vand.u32 31, %v670_v22  ;;  %v1475_v11 = vmul.f32 %v1316_v61, %v1465_v55 }
  0xe7   :  { %v462_v51 = vsub.s32 4294967266, %v1467_v57  ;;  %v1480_v21 = vadd.s32 %v588_v32, %v584_v15  ;;  %v313_v59 = vcvt.s32.f32 %v306_v26  ;;  %v542_v41 = vsel %vm536_vm9, %v539_v42, %v541_v7 }
  0xe8   :  { %v1478_v63 = vadd.s32 %v572_v56, %v563_v1  ;;  %v595_v62 = vadd.s32 %v594_v3, %v585_v4  ;;  %v1484_v58 = vsub.s32 32, %v672_v6  ;;  %v162_v34 = vsub.s32 4, %v1223_v12 }
  0xe9   :  { %v167_v24 = vmul.f32 -0.001358992, %v1448_v53  ;;  %v174_v61 = vmul.f32 -0.00019511016, %v1448_v53  ;;  %v314_v25 = vmul.f32 %v313_v59, %v311_v60  ;;  %v442_v15 = vadd.s32 %v1346_v35, %v1344_v47 }
  0xea   :  { %vm598_vm0 = vc.u32 %v1478_v63, %v1480_v21  ;;  %v599_v26 = vadd.s32 1, %v595_v62  ;;  %v665_v23 = vand.u32 8388607, %v1923_v5  ;;  %v458_v32 = vsub.s32 32, %v1467_v57 }
  0xeb   :  { %v463_v19 = vadd.s32 127, %v462_v51  ;;  %v596_v38 = vmul.u32 %v1417_v44, %v542_v41  ;;  %v676_v54 = vshrl.u32 %v1042_v39, %v1484_v58  ;;  %v1499_v16 = vshrl.u32 %v670_v22, 5 }
  0xec   :  { %v600_v33 = vsel %vm598_vm0, %v599_v26, %v595_v62  ;;  %v679_v60 = vshrl.u32 %v1043_v43, %v1484_v58  ;;  %v682_v47 = vshrl.u32 %v1925_v46, %v1484_v58  ;;  %v675_v30 = vshll.u32 %v1041_v37, %v672_v6 }
  0xed   :  { %v601_v35 = vadd.s32 %v600_v33, %v596_v38  ;;  %v678_v42 = vshll.u32 %v1042_v39, %v672_v6  ;;  %v681_v40 = vshll.u32 %v1043_v43, %v672_v6  ;;  %v684_v44 = vshll.u32 %v1925_v46, %v672_v6 }
  0xee   :  { %v685_v36 = vshrl.u32 %v1045_v49, %v1484_v58  ;;  %v687_v20 = vshll.u32 %v1045_v49, %v672_v6  ;;  %v688_v2 = vshrl.u32 %v1924_v52, %v1484_v58  ;;  %v464_v50 = vshll.u32 %v463_v19, 23 }
  0xef   :  { %v602_v7 = vadd.s32 536870912, %v601_v35  ;;  %v666_v1 = vor.u32 8388608, %v665_v23  ;;  %v1515_v56 = vor.u32 %v676_v54, %v675_v30  ;;  %v1517_v22 = vor.u32 %v679_v60, %v678_v42 }
  0xf0   :  { %v1519_v4 = vor.u32 %v682_v47, %v681_v40  ;;  %v686_v3 = vor.u32 %v685_v36, %v684_v44  ;;  %v689_v51 = vor.u32 %v688_v2, %v687_v20  ;;  %v168_v59 = vadd.f32 0.041655596, %v167_v24 }
  0xf1   :  { %v175_v41 = vadd.f32 0.008332121, %v174_v61  ;;  %vm1523_vm2 = vcmp.le.f32.partialorder %v193_v13, 0.7853982  ;;  %v1527_v62 = vshrl.u32 %v602_v7, 30  ;;  %vm693_vm5 = vcmp.lt.s32.totalorder %v1499_v16, 4 }
  0xf2   :  { %v315_v26 = vxor.u32 2147483648, %v314_v25  ;;  %v459_v23 = vshll.u32 %v1377_v27, %v1467_v57  ;;  %v460_v19 = vshrl.u32 %v442_v15, %v458_v32  ;;  %v699_v38 = vsel %vm693_vm5, %v686_v3, 920167782 }
  0xf3   :  { %v465_v24 = vor.u32 4788187, %v464_v50  ;;  %v604_v61 = vshll.u32 %v1527_v62, 30  ;;  %vm690_vm6 = vcmp.lt.s32.totalorder %v1499_v16, 1  ;;  %vm692_vm7 = vcmp.lt.s32.totalorder %v1499_v16, 3 }
  0xf4   :  { %v698_v13 = vsel %vm690_vm6, %v1515_v56, %v1517_v22  ;;  %v700_v27 = vsel %vm692_vm7, %v1519_v4, %v699_v38  ;;  %v703_v57 = vsel %vm693_vm5, %v689_v51, 1326507024  ;;  %v1546_v15 = vshll.u32 %v666_v1, 8 }
  0xf5   :  { %v1551_v32 = vsel %vm40_vm3, %v162_v34, %v1223_v12  ;;  %v317_v54 = vsub.s32 4, %v1302_v28  ;;  %v1554_v33 = vsub.s32 %v601_v35, %v604_v61  ;;  %v702_v60 = vsel %vm690_vm6, %v1517_v22, %v1519_v4 }
  0xf6   :  { %v169_v47 = vmul.f32 %v168_v59, %v1448_v53  ;;  %v461_v30 = vor.u32 %v460_v19, %v459_v23  ;;  %vm691_vm8 = vcmp.lt.s32.totalorder %v1499_v16, 2  ;;  %v704_v42 = vsel %vm692_vm7, %v686_v3, %v703_v57 }
  0xf7   :  { %v316_v12 = vsel %vm195_vm1, %v315_v26, %v314_v25  ;;  %vm606_vm3 = vcmp.lt.s32.totalorder %v1554_v33, 0  ;;  %v607_v34 = vsub.s32 0, %v1554_v33  ;;  %v701_v35 = vsel %vm691_vm8, %v698_v13, %v700_v27 }
  0xf8   :  { %v176_v40 = vmul.f32 %v175_v41, %v1448_v53  ;;  %v466_v44 = vand.u32 2147483647, %v465_v24  ;;  %v705_v36 = vsel %vm691_vm8, %v702_v60, %v704_v42  ;;  %v707_v20 = vand.u32 65535, %v1546_v15 }
  0xf9   :  { %v608_v2 = vsel %vm606_vm3, %v607_v34, %v1554_v33  ;;  %v708_v50 = vshrl.u32 %v1546_v15, 16  ;;  %v709_v25 = vand.u32 65535, %v705_v36  ;;  %v710_v7 = vshrl.u32 %v705_v36, 16 }
  0xfa   :  { %v1579_v1 = vsel %vm1523_vm2, %v1084_v9, %v316_v12  ;;  %v468_v3 = vcvt.s32.f32 %v461_v30  ;;  %v609_v51 = vclz %v608_v2  ;;  %v732_v59 = vshrl.u32 %v701_v35, 16 }
  0xfb   :  { %v165_v41 = vsel %vm1397_vm4, 0, %v1551_v32  ;;  %v712_v26 = vmul.u32 %v710_v7, %v707_v20  ;;  %v713_v23 = vmul.u32 %v709_v25, %v708_v50  ;;  %v731_v19 = vand.u32 65535, %v701_v35 }
  0xfc   :  { %v1584_v38 = vadd.f32 -0.4999988, %v169_v47  ;;  %v1589_v24 = vsel %vm195_vm1, %v317_v54, %v1302_v28  ;;  %v469_v61 = vmul.f32 %v468_v3, %v466_v44  ;;  %v1018_v13 = vadd.s32 4294967294, %v609_v51 }
  0xfd   :  { %v1591_v27 = vadd.f32 -0.16666654, %v176_v40  ;;  %v1595_v57 = vmul.f32 %v1579_v1, %v1579_v1  ;;  %v711_v60 = vmul.u32 %v709_v25, %v707_v20  ;;  %v715_v30 = vshll.u32 %v712_v26, 16 }
  0xfe   :  { %vm1019_vm9 = vcmp.lt.s32.totalorder %v1018_v13, 0  ;;  %v714_v42 = vmul.u32 %v710_v7, %v708_v50  ;;  %v717_v12 = vshll.u32 %v713_v23, 16  ;;  %v734_v47 = vmul.u32 %v732_v59, %v707_v20 }
  0xff   :  { %v612_v34 = vsel %vm1019_vm9, 0, %v1018_v13  ;;  %vm719_vm10 = vc.u32 %v711_v60, %v715_v30  ;;  %v721_v35 = vadd.s32 %v715_v30, %v711_v60  ;;  %v735_v36 = vmul.u32 %v731_v19, %v708_v50 }
 0x100   :  { %vm350_vm11 = vcmp.lt.s32.totalorder %v1095_v17, 0  ;;  %v470_v28 = vxor.u32 2147483648, %v469_v61  ;;  %v617_v54 = vsub.s32 4294967266, %v612_v34  ;;  %v720_v40 = vsel %vm719_vm10, 1, %v1040_v0 }
 0x101   :  { %v733_v44 = vmul.u32 %v731_v19, %v707_v20  ;;  %v716_v2 = vshrl.u32 %v712_v26, 16  ;;  %v722_v3 = vadd.s32 %v720_v40, %v714_v42  ;;  %vm723_vm12 = vc.u32 %v721_v35, %v717_v12 }
 0x102   :  { %v737_v25 = vshll.u32 %v734_v47, 16  ;;  %v613_v51 = vsub.s32 32, %v612_v34  ;;  %v618_v5 = vadd.s32 127, %v617_v54  ;;  %v724_v7 = vsel %vm723_vm12, 1, %v1040_v0 }
 0x103   :  { %v736_v52 = vmul.u32 %v732_v59, %v708_v50  ;;  %vm1602_vm13 = vcmp.le.f32.partialorder %v348_v45, 0.7853982  ;;  %v726_v60 = vadd.s32 %v724_v7, %v722_v3  ;;  %v739_v30 = vshll.u32 %v735_v36, 16 }
 0x104   :  { %vm741_vm14 = vc.u32 %v733_v44, %v737_v25  ;;  %v743_v46 = vadd.s32 %v737_v25, %v733_v44  ;;  %v597_v20 = vadd.s32 %v1480_v21, %v1478_v63  ;;  %v619_v26 = vshll.u32 %v618_v5, 23 }
 0x105   :  { %v695_v19 = vsel %vm693_vm5, %v1519_v4, 2102212464  ;;  %v742_v50 = vsel %vm741_vm14, 1, %v1040_v0  ;;  %v674_v45 = vshrl.u32 %v1041_v37, %v1484_v58  ;;  %v727_v59 = vadd.s32 %v726_v60, %v716_v2 }
 0x106   :  { %v744_v42 = vadd.s32 %v742_v50, %v736_v52  ;;  %vm745_vm15 = vc.u32 %v743_v46, %v739_v30  ;;  %v615_v12 = vshrl.u32 %v597_v20, %v613_v51  ;;  %v718_v35 = vshrl.u32 %v713_v23, 16 }
 0x107   :  { %v746_v54 = vsel %vm745_vm15, 1, %v1040_v0  ;;  %v816_v40 = vand.u32 2139095040, %v1475_v11  ;;  %v694_v5 = vsel %vm690_vm6, %v674_v45, %v1515_v56  ;;  %v696_v63 = vsel %vm692_vm7, %v1517_v22, %v695_v19 }
 0x108   :  { %v738_v21 = vshrl.u32 %v734_v47, 16  ;;  %v748_v4 = vadd.s32 %v746_v54, %v744_v42  ;;  %v614_v58 = vshll.u32 %v1554_v33, %v612_v34  ;;  %v620_v52 = vor.u32 4788187, %v619_v26 }
 0x109   :  { %v1623_v44 = vadd.s32 %v727_v59, %v718_v35  ;;  %v817_v23 = vshrl.u32 %v816_v40, 23  ;;  %v322_v2 = vmul.f32 -0.001358992, %v1595_v57  ;;  %v471_v3 = vsel %vm350_vm11, %v470_v28, %v469_v61 }
 0x10a   :  { %v740_v25 = vshrl.u32 %v735_v36, 16  ;;  %v749_v51 = vadd.s32 %v748_v4, %v738_v21  ;;  %v329_v56 = vmul.f32 -0.00019511016, %v1595_v57  ;;  %v616_v7 = vor.u32 %v615_v12, %v614_v58 }
 0x10b   :  { %v1629_v60 = vadd.s32 %v743_v46, %v739_v30  ;;  %v1023_v22 = vadd.s32 4294967169, %v817_v23  ;;  %v182_v33 = vadd.s32 3, %v165_v41  ;;  %v320_v47 = vsel %vm1523_vm2, 0, %v1589_v24 }
 0x10c   :  { %v697_v61 = vsel %vm691_vm8, %v694_v5, %v696_v63  ;;  %v750_v34 = vadd.s32 %v749_v51, %v740_v25  ;;  %v1643_v36 = vsel %vm1602_vm13, %v1095_v17, %v471_v3  ;;  %v621_v46 = vand.u32 2147483647, %v620_v52 }
 0x10d   :  { %vm753_vm0 = vc.u32 %v1623_v44, %v1629_v60  ;;  %v823_v31 = vadd.s32 1, %v1023_v22  ;;  %v171_v32 = vmul.f32 %v1584_v38, %v1448_v53  ;;  %v178_v6 = vmul.f32 %v1591_v27, %v1448_v53 }
 0x10e   :  { %v323_v41 = vadd.f32 0.041655596, %v322_v2  ;;  %v754_v16 = vadd.s32 1, %v750_v34  ;;  %v330_v24 = vadd.f32 0.008332121, %v329_v56  ;;  %v623_v28 = vcvt.s32.f32 %v616_v7 }
 0x10f   :  { %v751_v30 = vmul.u32 %v1546_v15, %v697_v61  ;;  %vm824_vm4 = vcmp.gt.s32.totalorder %v823_v31, 0  ;;  %v337_v20 = vadd.s32 3, %v320_v47  ;;  %v1654_v26 = vmul.f32 %v1643_v36, %v1643_v36 }
 0x110   :  { %v755_v19 = vsel %vm753_vm0, %v754_v16, %v750_v34  ;;  %v825_v50 = vsel %vm824_vm4, %v823_v31, 0  ;;  %v624_v45 = vmul.f32 %v623_v28, %v621_v46  ;;  %v1927_v38 = vand.u32 2147483647, %v1475_v11 }
 0x111   :  { %v756_v59 = vadd.s32 %v755_v19, %v751_v30  ;;  %v827_v42 = vand.u32 31, %v825_v50  ;;  %v1657_v53 = vadd.f32 1.0, %v171_v32  ;;  %v179_v27 = vadd.f32 1.0, %v178_v6 }
 0x112   :  { %v324_v12 = vmul.f32 %v323_v41, %v1595_v57  ;;  %v331_v15 = vmul.f32 %v330_v24, %v1595_v57  ;;  %v1661_v54 = vand.u32 3, %v182_v33  ;;  %v477_v40 = vmul.f32 -0.001358992, %v1654_v26 }
 0x113   :  { %v757_v35 = vadd.s32 536870912, %v756_v59  ;;  %v484_v5 = vmul.f32 -0.00019511016, %v1654_v26  ;;  %v1665_v63 = vsub.s32 32, %v827_v42  ;;  %v1667_v21 = vand.u32 3, %v337_v20 }
 0x114   :  { %v625_v4 = vxor.u32 2147483648, %v624_v45  ;;  %v820_v52 = vand.u32 8388607, %v1927_v38  ;;  %v1674_v23 = vmul.f32 %v179_v27, %v1422_v10  ;;  %vm1679_vm1 = vcmp.le.f32.partialorder %v503_v29, 0.7853982 }
 0x115   :  { %v1669_v58 = vshrl.u32 %v757_v35, 30  ;;  %vm505_vm2 = vcmp.lt.s32.totalorder %v1325_v14, 0  ;;  %v325_v25 = vadd.f32 -0.4999988, %v324_v12  ;;  %v332_v51 = vadd.f32 -0.16666654, %v331_v15 }
 0x116   :  { %v478_v22 = vadd.f32 0.041655596, %v477_v40  ;;  %v485_v33 = vadd.f32 0.008332121, %v484_v5  ;;  %v831_v10 = vshrl.u32 %v1042_v39, %v1665_v63  ;;  %v834_v47 = vshrl.u32 %v1043_v43, %v1665_v63 }
 0x117   :  { %v759_v7 = vshll.u32 %v1669_v58, 30  ;;  %v626_v29 = vsel %vm505_vm2, %v625_v4, %v624_v45  ;;  %v821_v34 = vor.u32 8388608, %v820_v52  ;;  %v840_v46 = vshrl.u32 %v1045_v49, %v1665_v63 }
 0x118   :  { %v830_v31 = vshll.u32 %v1041_v37, %v827_v42  ;;  %v833_v32 = vshll.u32 %v1042_v39, %v827_v42  ;;  %v1936_v6 = vmov 2102212464   ;;  %v1937_v16 = vmov 1326507024  }
 0x119   :  { %v760_v61 = vsub.s32 %v756_v59, %v759_v7  ;;  %v837_v41 = vshrl.u32 %v1936_v6, %v1665_v63  ;;  %v843_v24 = vshrl.u32 %v1937_v16, %v1665_v63  ;;  %v1700_v30 = vshrl.u32 %v825_v50, 5 }
 0x11a   :  { %v839_v20 = vshll.u32 %v1936_v6, %v827_v42  ;;  %v1703_v19 = vor.u32 %v831_v10, %v830_v31  ;;  %v1705_v45 = vor.u32 %v834_v47, %v833_v32  ;;  %v836_v59 = vshll.u32 %v1043_v43, %v827_v42 }
 0x11b   :  { %vm761_vm5 = vcmp.lt.s32.totalorder %v760_v61, 0  ;;  %v762_v28 = vsub.s32 0, %v760_v61  ;;  %v842_v39 = vshll.u32 %v1045_v49, %v827_v42  ;;  %v486_v27 = vmul.f32 %v485_v33, %v1654_v26 }
 0x11c   :  { %v1713_v12 = vsel %vm1679_vm1, %v1325_v14, %v626_v29  ;;  %v841_v50 = vor.u32 %v840_v46, %v839_v20  ;;  %v1716_v35 = vmul.f32 %v325_v25, %v1595_v57  ;;  %v1718_v5 = vor.u32 %v837_v41, %v836_v59 }
 0x11d   :  { %v763_v15 = vsel %vm761_vm5, %v762_v28, %v760_v61  ;;  %v844_v4 = vor.u32 %v843_v24, %v842_v39  ;;  %v1721_v43 = vmul.f32 %v332_v51, %v1595_v57  ;;  %v1724_v49 = vmul.f32 %v478_v22, %v1654_v26 }
 0x11e   :  { %v764_v40 = vclz %v763_v15  ;;  %vm845_vm6 = vcmp.lt.s32.totalorder %v1700_v30, 1  ;;  %v1727_v42 = vshll.u32 %v821_v34, 8  ;;  %v1731_v52 = vmul.f32 %v1713_v12, %v1713_v12 }
 0x11f   :  { %vm848_vm7 = vcmp.lt.s32.totalorder %v1700_v30, 4  ;;  %v853_v57 = vsel %vm845_vm6, %v1703_v19, %v1705_v45  ;;  %v1738_v51 = vadd.f32 -0.16666654, %v486_v27  ;;  %vm846_vm8 = vcmp.lt.s32.totalorder %v1700_v30, 2 }
 0x120   :  { %v1021_v25 = vadd.s32 4294967294, %v764_v40  ;;  %vm847_vm3 = vcmp.lt.s32.totalorder %v1700_v30, 3  ;;  %v854_v7 = vsel %vm848_vm7, %v841_v50, 920167782  ;;  %v857_v33 = vsel %vm845_vm6, %v1705_v45, %v1718_v5 }
 0x121   :  { %v855_v22 = vsel %vm847_vm3, %v1718_v5, %v854_v7  ;;  %v858_v10 = vsel %vm848_vm7, %v844_v4, 1326507024  ;;  %v752_v47 = vadd.s32 %v1629_v60, %v1623_v44  ;;  %v639_v31 = vmul.f32 -0.00019511016, %v1731_v52 }
 0x122   :  { %vm1022_vm9 = vcmp.lt.s32.totalorder %v1021_v25, 0  ;;  %v856_v34 = vsel %vm846_vm8, %v853_v57, %v855_v22  ;;  %v859_v46 = vsel %vm847_vm3, %v841_v50, %v858_v10  ;;  %v862_v41 = vand.u32 65535, %v1727_v42 }
 0x123   :  { %v767_v29 = vsel %vm1022_vm9, 0, %v1021_v25  ;;  %v860_v24 = vsel %vm846_vm8, %v857_v33, %v859_v46  ;;  %v886_v28 = vand.u32 65535, %v856_v34  ;;  %v887_v20 = vshrl.u32 %v856_v34, 16 }
 0x124   :  { %v768_v32 = vsub.s32 32, %v767_v29  ;;  %v772_v6 = vsub.s32 4294967266, %v767_v29  ;;  %v769_v16 = vshll.u32 %v760_v61, %v767_v29  ;;  %v864_v59 = vand.u32 65535, %v860_v24 }
 0x125   :  { %v865_v39 = vshrl.u32 %v860_v24, 16  ;;  %v632_v15 = vmul.f32 -0.001358992, %v1731_v52  ;;  %v863_v50 = vshrl.u32 %v1727_v42, 16  ;;  %v889_v40 = vmul.u32 %v887_v20, %v862_v41 }
 0x126   :  { %v770_v44 = vshrl.u32 %v752_v47, %v768_v32  ;;  %v773_v60 = vadd.s32 127, %v772_v6  ;;  %v640_v4 = vadd.f32 0.008332121, %v639_v31  ;;  %vm660_vm10 = vcmp.lt.s32.totalorder %v1393_v18, 0 }
 0x127   :  { %v867_v61 = vmul.u32 %v865_v39, %v862_v41  ;;  %v829_v7 = vshrl.u32 %v1041_v37, %v1665_v63  ;;  %v868_v22 = vmul.u32 %v864_v59, %v863_v50  ;;  %v890_v33 = vmul.u32 %v886_v28, %v863_v50 }
 0x128   :  { %v771_v25 = vor.u32 %v770_v44, %v769_v16  ;;  %v774_v57 = vshll.u32 %v773_v60, 23  ;;  %v892_v10 = vshll.u32 %v889_v40, 16  ;;  %v1938_v47 = vand.u32 2147483647, %v1393_v18 }
 0x129   :  { %v866_v46 = vmul.u32 %v864_v59, %v862_v41  ;;  %v870_v31 = vshll.u32 %v867_v61, 16  ;;  %v888_v32 = vmul.u32 %v886_v28, %v862_v41  ;;  %v869_v16 = vmul.u32 %v865_v39, %v863_v50 }
 0x12a   :  { %vm1771_vm12 = vcmp.le.f32.partialorder %v1938_v47, 0.7853982  ;;  %v775_v34 = vor.u32 4788187, %v774_v57  ;;  %v778_v6 = vcvt.s32.f32 %v771_v25  ;;  %v872_v24 = vshll.u32 %v868_v22, 16 }
 0x12b   :  { %v891_v44 = vmul.u32 %v887_v20, %v863_v50  ;;  %vm874_vm14 = vc.u32 %v866_v46, %v870_v31  ;;  %v876_v37 = vadd.s32 %v870_v31, %v866_v46  ;;  %vm896_vm15 = vc.u32 %v888_v32, %v892_v10 }
 0x12c   :  { %v776_v60 = vand.u32 2147483647, %v775_v34  ;;  %v875_v63 = vsel %vm874_vm14, 1, %v1040_v0  ;;  %v894_v38 = vshll.u32 %v890_v33, 16  ;;  %v897_v47 = vsel %vm896_vm15, 1, %v1040_v0 }
 0x12d   :  { %v898_v2 = vadd.s32 %v892_v10, %v888_v32  ;;  %v877_v56 = vadd.s32 %v875_v63, %v869_v16  ;;  %vm878_vm0 = vc.u32 %v876_v37, %v872_v24  ;;  %v899_v59 = vadd.s32 %v897_v47, %v891_v44 }
 0x12e   :  { %v779_v27 = vmul.f32 %v778_v6, %v776_v60  ;;  %v641_v41 = vmul.f32 %v640_v4, %v1731_v52  ;;  %v850_v28 = vsel %vm848_vm7, %v1718_v5, 2102212464  ;;  %v879_v20 = vsel %vm878_vm0, 1, %v1040_v0 }
 0x12f   :  { %vm900_vm4 = vc.u32 %v898_v2, %v894_v38  ;;  %v871_v50 = vshrl.u32 %v867_v61, 16  ;;  %v881_v25 = vadd.s32 %v879_v20, %v877_v56  ;;  %v633_v34 = vadd.f32 0.041655596, %v632_v15 }
 0x130   :  { %v780_v39 = vxor.u32 2147483648, %v779_v27  ;;  %v901_v57 = vsel %vm900_vm4, 1, %v1040_v0  ;;  %v849_v10 = vsel %vm845_vm6, %v829_v7, %v1703_v19  ;;  %v893_v46 = vshrl.u32 %v889_v40, 16 }
 0x131   :  { %v903_v31 = vadd.s32 %v901_v57, %v899_v59  ;;  %v851_v5 = vsel %vm847_vm3, %v1705_v45, %v850_v28  ;;  %v873_v32 = vshrl.u32 %v868_v22, 16  ;;  %v882_v6 = vadd.s32 %v881_v25, %v871_v50 }
 0x132   :  { %v781_v4 = vsel %vm660_vm10, %v780_v39, %v779_v27  ;;  %v782_v56 = vsub.s32 4, %v1669_v58  ;;  %v895_v15 = vshrl.u32 %v890_v33, 16  ;;  %v642_v40 = vadd.f32 -0.16666654, %v641_v41 }
 0x133   :  { %v1795_v0 = vsel %vm1771_vm12, %v1393_v18, %v781_v4  ;;  %v904_v19 = vadd.s32 %v903_v31, %v893_v46  ;;  %v1799_v27 = vadd.s32 %v882_v6, %v873_v32  ;;  %v1801_v7 = vadd.s32 %v898_v2, %v894_v38 }
 0x134   :  { %v786_v61 = vmul.f32 %v1795_v0, %v1795_v0  ;;  %v1941_v45 = vsub.s32 4, %v1357_v48  ;;  %v488_v16 = vmul.f32 %v1738_v51, %v1654_v26  ;;  %v852_v33 = vsel %vm846_vm8, %v849_v10, %v851_v5 }
 0x135   :  { %v905_v24 = vadd.s32 %v904_v19, %v895_v15  ;;  %vm188_vm5 = vcmp.eq.s32.totalorder %v1661_v54, 2  ;;  %v634_v44 = vmul.f32 %v633_v34, %v1731_v52  ;;  %vm908_vm6 = vc.u32 %v1799_v27, %v1801_v7 }
 0x136   :  { %v473_v22 = vsel %vm350_vm11, %v1941_v45, %v1357_v48  ;;  %v787_v60 = vmul.f32 -0.001358992, %v786_v61  ;;  %v794_v38 = vmul.f32 -0.00019511016, %v786_v61  ;;  %vm185_vm7 = vcmp.eq.s32.totalorder %v1661_v54, 0 }
 0x137   :  { %v480_v48 = vadd.f32 -0.4999988, %v1724_v49  ;;  %v1942_v2 = vsub.s32 4, %v1527_v62  ;;  %v783_v51 = vsel %vm660_vm10, %v782_v56, %v1669_v58  ;;  %v909_v37 = vadd.s32 1, %v905_v24 }
 0x138   :  { %v643_v63 = vmul.f32 %v642_v40, %v1731_v52  ;;  %v788_v47 = vadd.f32 0.041655596, %v787_v60  ;;  %v795_v59 = vadd.f32 0.008332121, %v794_v38  ;;  %v906_v41 = vmul.u32 %v1727_v42, %v852_v33 }
 0x139   :  { %v628_v30 = vsel %vm505_vm2, %v1942_v2, %v1527_v62  ;;  %v334_v28 = vadd.f32 1.0, %v1721_v43  ;;  %v475_v49 = vsel %vm1602_vm13, 0, %v473_v22  ;;  %v489_v20 = vadd.f32 1.0, %v488_v16 }
 0x13a   :  { %v910_v39 = vsel %vm908_vm6, %v909_v37, %v905_v24  ;;  %vm184_vm11 = vcmp.lt.s32.totalorder %v1661_v54, 2  ;;  %v635_v62 = vadd.f32 -0.4999988, %v634_v44  ;;  %v789_v50 = vmul.f32 %v788_v47, %v786_v61 }
 0x13b   :  { %v796_v25 = vmul.f32 %v795_v59, %v786_v61  ;;  %v911_v58 = vadd.s32 %v910_v39, %v906_v41  ;;  %v186_v57 = vxor.u32 2147483648, %v1674_v23  ;;  %v481_v34 = vmul.f32 %v480_v48, %v1654_v26 }
 0x13c   :  { %v630_v42 = vsel %vm1679_vm1, 0, %v628_v30  ;;  %v785_v43 = vsel %vm1771_vm12, 0, %v783_v51  ;;  %vm340_vm13 = vcmp.eq.s32.totalorder %v1667_v21, 0  ;;  %vm343_vm2 = vcmp.eq.s32.totalorder %v1667_v21, 2 }
 0x13d   :  { %v644_v13 = vadd.f32 1.0, %v643_v63  ;;  %v790_v10 = vadd.f32 -0.4999988, %v789_v50  ;;  %v797_v46 = vadd.f32 -0.16666654, %v796_v25  ;;  %v912_v31 = vadd.s32 536870912, %v911_v58 }
 0x13e   :  { %v327_v4 = vadd.f32 1.0, %v1716_v35  ;;  %v335_v5 = vmul.f32 %v334_v28, %v1579_v1  ;;  %v490_v26 = vmul.f32 %v489_v20, %v1643_v36  ;;  %v492_v32 = vadd.s32 3, %v475_v49  ;;  %v977_v49 = vpop.permute.xlu1 %976 }
 0x13f   :  { %v636_v3 = vmul.f32 %v635_v62, %v1731_v52  ;;  %v791_v6 = vmul.f32 %v790_v10, %v786_v61  ;;  %v798_v29 = vmul.f32 %v797_v46, %v786_v61  ;;  %v1844_v56 = vshrl.u32 %v912_v31, 30 }
 0x140   :  { %v1943_v15 = vxor.u32 2147483648, %v1657_v53  ;;  %vm339_vm1 = vcmp.lt.s32.totalorder %v1667_v21, 2  ;;  %v482_v35 = vadd.f32 1.0, %v481_v34  ;;  %v647_v40 = vadd.s32 3, %v630_v42 }
 0x141   :  { %v802_v1 = vadd.s32 3, %v785_v43  ;;  %v187_v36 = vsel %vm185_vm7, %v1657_v53, %v186_v57  ;;  %v645_v52 = vmul.f32 %v644_v13, %v1713_v12  ;;  %v799_v61 = vadd.f32 1.0, %v798_v29 }
 0x142   :  { %v190_v19 = vsel %vm188_vm5, %v1943_v15, %v1674_v23  ;;  %v914_v45 = vshll.u32 %v1844_v56, 30  ;;  %v341_v22 = vxor.u32 2147483648, %v335_v5  ;;  %v344_v16 = vxor.u32 2147483648, %v327_v4 }
 0x143   :  { %v493_v33 = vand.u32 3, %v492_v32  ;;  %v496_v24 = vxor.u32 2147483648, %v490_v26  ;;  %v637_v44 = vadd.f32 1.0, %v636_v3  ;;  %v792_v23 = vadd.f32 1.0, %v791_v6 }
 0x144   :  { %v800_v60 = vmul.f32 %v799_v61, %v1795_v0  ;;  %v915_v38 = vsub.s32 %v911_v58, %v914_v45  ;;  %vm181_vm8 = vweird.f32 %v1082_v8  ;;  %v191_v48 = vsel %vm184_vm11, %v187_v36, %v190_v19  ;;  %v1035_v61 = vld [vmem:[%s1921_s1] sm:$0xff] }
 0x145   :  { %vm336_vm3 = vweird.f32 %v1084_v9  ;;  %v499_v53 = vxor.u32 2147483648, %v482_v35  ;;  %v648_v12 = vand.u32 3, %v647_v40  ;;  %v803_v2 = vand.u32 3, %v802_v1 }
 0x146   :  { %vm491_vm9 = vweird.f32 %v1095_v17  ;;  %v651_v30 = vxor.u32 2147483648, %v645_v52  ;;  %v806_v51 = vxor.u32 2147483648, %v800_v60  ;;  %vm916_vm10 = vcmp.lt.s32.totalorder %v915_v38, 0  ;;  %v982_v40 = vpop.permute.xlu1 %981 }
 0x147   :  { %v917_v37 = vsub.s32 0, %v915_v38  ;;  %v342_v0 = vsel %vm340_vm13, %v327_v4, %v341_v22  ;;  %v345_v63 = vsel %vm343_vm2, %v344_v16, %v335_v5  ;;  %vm494_vm12 = vcmp.lt.s32.totalorder %v493_v33, 2  ;;  %v1036_v22 = vld [vmem:[%s1921_s1 + $0x8] sm:$0xff] }
 0x148   :  { %vm495_vm14 = vcmp.eq.s32.totalorder %v493_v33, 0  ;;  %v654_v47 = vxor.u32 2147483648, %v637_v44  ;;  %v809_v59 = vxor.u32 2147483648, %v792_v23  ;;  %vm498_vm15 = vcmp.eq.s32.totalorder %v493_v33, 2  ;;  %v1037_v33 = vld [vmem:[%s1921_s1 + $0x10] sm:$0xff] }
 0x149   :  { %v497_v54 = vsel %vm495_vm14, %v482_v35, %v496_v24  ;;  %v918_v41 = vsel %vm916_vm10, %v917_v37, %v915_v38  ;;  %vm650_vm0 = vcmp.eq.s32.totalorder %v648_v12, 0  ;;  %vm805_vm4 = vcmp.eq.s32.totalorder %v803_v2, 0 }
 0x14a   :  { %v919_v28 = vclz %v918_v41  ;;  %v346_v20 = vsel %vm339_vm1, %v342_v0, %v345_v63  ;;  %v500_v39 = vsel %vm498_vm15, %v499_v53, %v490_v26  ;;  %v652_v62 = vsel %vm650_vm0, %v637_v44, %v651_v30 }
 0x14b   :  { %v807_v50 = vsel %vm805_vm4, %v792_v23, %v806_v51  ;;  %v501_v25 = vsel %vm494_vm12, %v497_v54, %v500_v39  ;;  %vm653_vm5 = vcmp.eq.s32.totalorder %v648_v12, 2  ;;  %vm808_vm6 = vcmp.eq.s32.totalorder %v803_v2, 2 }
 0x14c   :  { %v1024_v58 = vadd.s32 4294967294, %v919_v28  ;;  %vm649_vm7 = vcmp.lt.s32.totalorder %v648_v12, 2  ;;  %v655_v57 = vsel %vm653_vm5, %v654_v47, %v645_v52  ;;  %vm804_vm11 = vcmp.lt.s32.totalorder %v803_v2, 2 }
 0x14d   :  { %v810_v34 = vsel %vm808_vm6, %v809_v59, %v800_v60  ;;  %vm646_vm13 = vweird.f32 %v1325_v14  ;;  %v656_v42 = vsel %vm649_vm7, %v652_v62, %v655_v57  ;;  %v192_v21 = vsel %vm181_vm8, nan, %v191_v48  ;;  %v1038_v60 = vld [vmem:[%s1921_s1 + $0x18] sm:$0xff]  ;;  %v1039_v48 = vld [vmem:[%s1921_s1 + $0x20] sm:$0xff] }
 0x14e   :  { %v811_v43 = vsel %vm804_vm11, %v807_v50, %v810_v34  ;;  %vm1025_vm2 = vcmp.lt.s32.totalorder %v1024_v58, 0  ;;  %v347_v13 = vsel %vm336_vm3, nan, %v346_v20  ;;  %vm801_vm1 = vweird.f32 %v1393_v18 }
 0x14f   :  { %v922_v10 = vsel %vm1025_vm2, 0, %v1024_v58  ;;  %v502_v46 = vsel %vm491_vm9, nan, %v501_v25  ;;  %v907_v31 = vadd.s32 %v1801_v7, %v1799_v27  ;;  %v657_v5 = vsel %vm646_vm13, nan, %v656_v42 }
 0x150   :  { %v923_v4 = vsub.s32 32, %v922_v10  ;;  %v927_v14 = vsub.s32 4294967266, %v922_v10  ;;  %v812_v26 = vsel %vm801_vm1, nan, %v811_v43  ;;  %v924_v32 = vshll.u32 %v915_v38, %v922_v10 }
 0x151   :  { %v968_v6 = vmul.f32 %v192_v21, %v192_v21  ;;  %v969_v29 = vmul.f32 %v347_v13, %v347_v13  ;;  %v970_v9 = vmul.f32 %v502_v46, %v502_v46  ;;  %v971_v18 = vmul.f32 %v657_v5, %v657_v5 }
 0x152   :  { %v925_v3 = vshrl.u32 %v907_v31, %v923_v4  ;;  %v928_v8 = vadd.s32 127, %v927_v14  ;;  %v972_v35 = vmul.f32 %v812_v26, %v812_v26  ;;  %vm815_vm8 = vcmp.lt.s32.totalorder %v1475_v11, 0 }
 0x153   :  { %v984_v17 = vmul.f32 %v977_v49, %v968_v6  ;;  %v985_v1 = vmul.f32 %v977_v49, %v969_v29  ;;  %v986_v36 = vmul.f32 %v977_v49, %v970_v9  ;;  %v987_v27 = vmul.f32 %v982_v40, %v971_v18 }
 0x154   :  { %v926_v15 = vor.u32 %v925_v3, %v924_v32  ;;  %v929_v19 = vshll.u32 %v928_v8, 23  ;;  %v988_v7 = vmul.f32 %v982_v40, %v972_v35  ;;  %v1944_v30 = vand.u32 2147483647, %v1475_v11 }
 0x155   :  { %v990_v45 = vadd.f32 %v1035_v61, %v984_v17  ;;  %v991_v16 = vadd.f32 %v1036_v22, %v985_v1  ;;  %v992_v24 = vadd.f32 %v1037_v33, %v986_v36  ;;  %v993_v38 = vadd.f32 %v1038_v60, %v987_v27 }
 0x156   :  { %v930_v52 = vor.u32 4788187, %v929_v19  ;;  %v933_v23 = vcvt.s32.f32 %v926_v15  ;;  %v994_v53 = vadd.f32 %v1039_v48, %v988_v7  ;;  %vm814_vm3 = vcmp.le.f32.partialorder %v1944_v30, 0.7853982 }
 0x157   :  { %996 = vst [vmem:[%s1922_s2] sm:$0xff] %v990_v45  ;;  %v937_v37 = vsub.s32 4, %v1844_v56  ;;  %vm956_vm14 = vweird.f32 %v1475_v11 }
 0x158   :  { %v931_v44 = vand.u32 2147483647, %v930_v52  ;;  %997 = vst [vmem:[%s1922_s2 + $0x8] sm:$0xff] %v991_v16 }
 0x159   :  { %998 = vst [vmem:[%s1922_s2 + $0x10] sm:$0xff] %v992_v24  ;;  %v938_v59 = vsel %vm815_vm8, %v937_v37, %v1844_v56 }
 0x15a   :  { %v934_v12 = vmul.f32 %v933_v23, %v931_v44  ;;  %999 = vst [vmem:[%s1922_s2 + $0x18] sm:$0xff] %v993_v38  ;;  %v940_v49 = vsel %vm814_vm3, 0, %v938_v59 }
 0x15b   :  { %1000 = vst [vmem:[%s1922_s2 + $0x20] sm:$0xff] %v994_v53  ;;  %v957_v25 = vadd.s32 3, %v940_v49 }
 0x15c   :  { %v935_v2 = vxor.u32 2147483648, %v934_v12 }
 0x15d   :  { %v958_v43 = vand.u32 3, %v957_v25 }
 0x15e   :  { %v936_v51 = vsel %vm815_vm8, %v935_v2, %v934_v12 }
 0x15f   :  { %v939_v0 = vsel %vm814_vm3, %v1475_v11, %v936_v51  ;;  %vm960_vm9 = vcmp.eq.s32.totalorder %v958_v43, 0  ;;  %vm963_vm10 = vcmp.eq.s32.totalorder %v958_v43, 2  ;;  %vm959_vm12 = vcmp.lt.s32.totalorder %v958_v43, 2 }
 0x160   :  { %v941_v63 = vmul.f32 %v939_v0, %v939_v0 }
 0x162   :  { %v942_v54 = vmul.f32 -0.001358992, %v941_v63  ;;  %v949_v47 = vmul.f32 -0.00019511016, %v941_v63 }
 0x164   :  { %v943_v41 = vadd.f32 0.041655596, %v942_v54  ;;  %v950_v28 = vadd.f32 0.008332121, %v949_v47 }
 0x166   :  { %v944_v20 = vmul.f32 %v943_v41, %v941_v63  ;;  %v951_v39 = vmul.f32 %v950_v28, %v941_v63 }
 0x168   :  { %v945_v62 = vadd.f32 -0.4999988, %v944_v20  ;;  %v952_v50 = vadd.f32 -0.16666654, %v951_v39 }
 0x16a   :  { %v946_v58 = vmul.f32 %v945_v62, %v941_v63  ;;  %v953_v57 = vmul.f32 %v952_v50, %v941_v63 }
 0x16c   :  { %v947_v34 = vadd.f32 1.0, %v946_v58  ;;  %v954_v42 = vadd.f32 1.0, %v953_v57 }
 0x16e   :  { %v955_v21 = vmul.f32 %v954_v42, %v939_v0  ;;  %v964_v13 = vxor.u32 2147483648, %v947_v34 }
 0x170   :  { %v961_v10 = vxor.u32 2147483648, %v955_v21  ;;  %v965_v46 = vsel %vm963_vm10, %v964_v13, %v955_v21 }
 0x172   :  { %v962_v56 = vsel %vm960_vm9, %v947_v34, %v961_v10 }
 0x173   :  { %v966_v31 = vsel %vm959_vm12, %v962_v56, %v965_v46 }
 0x174   :  { %v967_v4 = vsel %vm956_vm14, nan, %v966_v31 }
 0x175   :  { %v973_v14 = vmul.f32 %v967_v4, %v967_v4 }
 0x177   :  { %v989_v5 = vmul.f32 %v982_v40, %v973_v14 }
 0x179   :  { %v995_v26 = vadd.f32 %v989_v5, %v1465_v55 }
 0x17b   :  { %1001 = vst [vmem:[%s1922_s2 + $0x28] sm:$0xff] %v995_v26 }

</bundles_post_ra>
